<compile_context>
chip_gen: v6e
topology: v6e:2x2x1
jax: 0.10.0
libtpu: 0.0.40
codegen_flags: <defaults>
</compile_context>

<pallas_src>
import jax
import jax.numpy as jnp
import numpy as np
from jax.experimental import pallas as pl
from jax.experimental.pallas import tpu as pltpu


_HEAD_PAD = 128  # lane-dense classifier output width; sliced back to 1 in the wrapper


# ----------------------------------------------------------------------------
# Fused kernel: whole network per batch tile, parameters resident in VMEM.
# ----------------------------------------------------------------------------
def _make_fused_mlp_kernel(n_layers):
    """Ref layout (inputs then outputs):
      refs[0]                          x tile          (TM, in_features)
      inner layers l = 0..n_layers-2:  (w, b)           2 refs each   (BN folded forward)
      last layer:                      (w, b, s, t)     4 refs
      head:                            (w_head, b_head) lane-padded to 128
      refs[-2]                         feat tile        (TM, n_last)
      refs[-1]                         head tile        (TM, 128)
    """

    def kernel(*refs):
        x_ref = refs[0]
        feat_ref = refs[-2]
        head_ref = refs[-1]

        h = x_ref[...]
        idx = 1
        for l in range(n_layers):
            if l < n_layers - 1:
                # Linear (MXU, f32 acc) + bias + ReLU.  This layer's BatchNorm(eval)
                # scale/shift was folded into the NEXT layer's weight/bias offline.
                w_ref, b_ref = refs[idx], refs[idx + 1]
                idx += 2
                z = jnp.dot(h.astype(w_ref.dtype), w_ref[...],
                            preferred_element_type=jnp.float32)
                h = jnp.maximum(z + b_ref[...], 0.0)
            else:
                # Last feature layer keeps its BN scale/shift (post-BN value == feat).
                w_ref, b_ref, s_ref, t_ref = refs[idx:idx + 4]
                idx += 4
                z = jnp.dot(h.astype(w_ref.dtype), w_ref[...],
                            preferred_element_type=jnp.float32)
                z = jnp.maximum(z + b_ref[...], 0.0)
                h = z * s_ref[...] + t_ref[...]
            # Dropout(p=0.1) is identity in eval mode.

        wh_ref, bh_ref = refs[idx], refs[idx + 1]
        feat_ref[...] = h.astype(feat_ref.dtype)

        # Classifier head (surv_fc): Linear + Sigmoid, lane-padded to 128 columns.
        z = jnp.dot(h.astype(wh_ref.dtype), wh_ref[...],
                    preferred_element_type=jnp.float32) + bh_ref[...]
        # exp on the EUP + approximate reciprocal (EUP vrcp) -> no VALU divide.
        head_ref[...] = pl.reciprocal(1.0 + jnp.exp(-z), approx=True).astype(head_ref.dtype)

    return kernel


def _fused_mlp_pallas(x2d, inner_layers, last_layer, head, tm):
    """x2d: (Bp, in_features), Bp a multiple of tm.  Returns (head_out (Bp,128), feat (Bp,n_last))."""
    Bp, in_features = x2d.shape
    n_last = last_layer[0].shape[1]
    wh, bh = head

    flat_params = []
    for (w, b) in inner_layers:
        flat_params += [w, b]
    flat_params += list(last_layer)
    flat_params += [wh, bh]

    grid = (Bp // tm,)

    x_spec = pl.BlockSpec((tm, in_features), lambda i: (i, 0))
    # Parameters: full-array blocks with a constant block index -> resident in VMEM,
    # no re-DMA across grid iterations.
    param_specs = [pl.BlockSpec(p.shape, lambda i: (0, 0)) for p in flat_params]
    out_specs = (
        pl.BlockSpec((tm, n_last), lambda i: (i, 0)),
        pl.BlockSpec((tm, _HEAD_PAD), lambda i: (i, 0)),
    )

    # Advisory cost estimate for the XLA scheduler.
    layer_dims = [w.shape for (w, _) in inner_layers] + [last_layer[0].shape]
    matmul_flops = 2 * Bp * (sum(a * b for a, b in layer_dims) + n_last * _HEAD_PAD)
    param_bytes = sum(int(np.prod(p.shape)) * p.dtype.itemsize for p in flat_params)
    io_bytes = (int(np.prod(x2d.shape)) * x2d.dtype.itemsize + param_bytes
                + Bp * n_last * 4 + Bp * _HEAD_PAD * 4)
    cost = pl.CostEstimate(flops=matmul_flops,
                           transcendentals=Bp * _HEAD_PAD,
                           bytes_accessed=io_bytes)

    n_layers = len(inner_layers) + 1
    feat, head_out = pl.pallas_call(
        _make_fused_mlp_kernel(n_layers),
        out_shape=(
            jax.ShapeDtypeStruct((Bp, n_last), jnp.float32),
            jax.ShapeDtypeStruct((Bp, _HEAD_PAD), jnp.float32),
        ),
        grid=grid,
        in_specs=[x_spec] + param_specs,
        out_specs=out_specs,
        compiler_params=pltpu.CompilerParams(
            dimension_semantics=("parallel",),      # megacore batch sharding on v7x
            vmem_limit_bytes=32 * 1024 * 1024,       # explicit; safe on v5e/v6e/v7x
        ),
        cost_estimate=cost,
    )(x2d, *flat_params)
    return head_out, feat


# ----------------------------------------------------------------------------
# Offline BatchNorm fold (exact): scale/shift of inner layers -> next Linear.
# ----------------------------------------------------------------------------
def _fold_bn(feature_layers):
    """(relu(z_l)*s_l + t_l) @ W_{l+1} + b_{l+1}
         == relu(z_l) @ (diag(s_l) @ W_{l+1}) + (t_l @ W_{l+1} + b_{l+1}).
    Returns (inner_layers [(w', b'), ...], last_layer (w', b', s, t))."""
    n = len(feature_layers)
    inner = []
    last = None
    carry_s = carry_t = None
    for l, (w, b, s, t) in enumerate(feature_layers):
        wd = w.dtype
        w32 = w.astype(jnp.float32)
        b32 = b.astype(jnp.float32)
        if carry_s is not None:
            b32 = b32 + jnp.dot(carry_t, w32)            # uses the ORIGINAL W_l
            w32 = w32 * carry_s.reshape(-1, 1)            # diag(s_{l-1}) @ W_l
        if l < n - 1:
            inner.append((w32.astype(wd), b32))
            carry_s, carry_t = s, t
        else:
            last = (w32.astype(wd), b32, s, t)
    return inner, last


# ----------------------------------------------------------------------------
# Full forward (x.view(B, -1) -> feature MLP -> classifier head)
# ----------------------------------------------------------------------------
def _forward_impl(x, feature_layers, head):
    B = x.shape[0]
    wdtype = jnp.dtype(feature_layers[0][0].dtype)
    # Pre-cast activations to the weight dtype (bf16 halves the x DMA; identical
    # numerics because the kernel casts before the first dot anyway).
    act_dtype = jnp.bfloat16 if wdtype == jnp.bfloat16 else jnp.float32
    h = x.reshape(B, -1).astype(act_dtype)

    # MXU-friendly batch tiling: TM=256 for large batches (256-wide MXU on v6e/v7x),
    # else round the tiny batch up to a sublane multiple and run a single grid step.
    TM = 256 if B >= 256 else ((B + 7) // 8) * 8
    Bp = ((B + TM - 1) // TM) * TM
    if Bp != B:
        h = jnp.pad(h, ((0, Bp - B), (0, 0)))

    inner_layers, last_layer = _fold_bn(feature_layers)
    head_out, feat = _fused_mlp_pallas(h, inner_layers, last_layer, head, TM)
    final_x = head_out[:B, :1]   # slice the lane-padded head back to (B, 1)
    return final_x, feat[:B]


mlp_disentangle_forward = jax.jit(_forward_impl)


# ----------------------------------------------------------------------------
# Parameter construction (deterministic, mimics the PyTorch inits; eval-mode BN
# running stats folded to per-feature scale/shift)
# ----------------------------------------------------------------------------
def init_params(key, in_features, num_nodes, param_dtype=jnp.float32):
    """Returns (feature_layers, head).

    feature_layers: list of (w(in,out)[param_dtype], b(1,out) f32, bn_scale(1,out) f32,
                             bn_shift(1,out) f32)
    head:           (w(last,128)[param_dtype] lane-padded, b(1,128) f32 lane-padded)
    """
    dims = (in_features,) + tuple(num_nodes)
    layers = []
    eps = 1e-5
    for n_in, n_out in zip(dims[:-1], dims[1:]):
        key, kw, kb, km, kv = jax.random.split(key, 5)
        # kaiming_normal_(nonlinearity='relu'): std = sqrt(2 / fan_in)
        w = (jax.random.normal(kw, (n_in, n_out), jnp.float32)
             * np.sqrt(2.0 / n_in)).astype(param_dtype)
        bound = 1.0 / np.sqrt(float(n_in))
        b = jax.random.uniform(kb, (1, n_out), jnp.float32, -bound, bound)
        # BatchNorm1d eval: gamma=1, beta=0, plus non-trivial running stats so the
        # offline fold is actually exercised by the test.
        gamma = jnp.ones((1, n_out), jnp.float32)
        beta = jnp.zeros((1, n_out), jnp.float32)
        run_mean = 0.1 * jax.random.normal(km, (1, n_out), jnp.float32)
        run_var = jax.random.uniform(kv, (1, n_out), jnp.float32, 0.5, 1.5)
        scale = gamma / jnp.sqrt(run_var + eps)
        shift = beta - scale * run_mean
        layers.append((w, b, scale, shift))

    n_last = dims[-1]
    key, kw, kb = jax.random.split(key, 3)
    bound = 1.0 / np.sqrt(float(n_last))
    wh = jax.random.uniform(kw, (n_last, 1), jnp.float32, -bound, bound)
    bh = jax.random.uniform(kb, (1, 1), jnp.float32, -bound, bound)
    # Lane-pad the head to 128 output columns (unmasked lane-dense stores in the kernel).
    wh_p = jnp.zeros((n_last, _HEAD_PAD), jnp.float32).at[:, :1].set(wh).astype(param_dtype)
    bh_p = jnp.zeros((1, _HEAD_PAD), jnp.float32).at[:, :1].set(bh)
    return layers, (wh_p, bh_p)


# ----------------------------------------------------------------------------
# Pure-JAX reference (unfolded: Linear -> ReLU -> BN(eval) per layer, then sigmoid head)
# ----------------------------------------------------------------------------
def reference_forward(x, feature_layers, head):
    h = x.reshape(x.shape[0], -1).astype(jnp.float32)
    for (w, b, s, t) in feature_layers:
        z = jnp.dot(h.astype(w.dtype), w, preferred_element_type=jnp.float32)
        h = jnp.maximum(z + b, 0.0) * s + t
    wh, bh = head
    z = jnp.dot(h.astype(wh.dtype), wh, preferred_element_type=jnp.float32) + bh
    return jax.nn.sigmoid(z)[:, :1], h


if __name__ == "__main__":
    key = jax.random.PRNGKey(0)
    key, kx = jax.random.split(key)

    # Small shapes consistent with the module (scaled-down analogue of 1024 -> [1024,512,128]).
    B = 8
    in_features = 256
    num_nodes = (256, 128, 128)
    x = jax.random.normal(kx, (B, 4, 8, 8), jnp.float32)  # flattens to (B, 256)

    # --- f32 weights: tight tolerance (BN fold + approx reciprocal are the only deltas) ---
    layers_f32, head_f32 = init_params(key, in_features, num_nodes, jnp.float32)
    final_x, feat = mlp_disentangle_forward(x, layers_f32, head_f32)
    final_x = jax.block_until_ready(final_x)
    feat = jax.block_until_ready(feat)

    ref_final, ref_feat = reference_forward(x, layers_f32, head_f32)
    np.testing.assert_allclose(np.asarray(feat), np.asarray(ref_feat),
                               rtol=1e-4, atol=1e-4)
    np.testing.assert_allclose(np.asarray(final_x), np.asarray(ref_final),
                               rtol=2e-3, atol=2e-3)

    # --- bf16 weights (MXU-native on v5e/v6e/v7x; halves weight + activation DMA) ---
    layers_bf16, head_bf16 = init_params(key, in_features, num_nodes, jnp.bfloat16)
    final_b, feat_b = mlp_disentangle_forward(x, layers_bf16, head_bf16)
    final_b = jax.block_until_ready(final_b)
    feat_b = jax.block_until_ready(feat_b)

    ref_final_b, ref_feat_b = reference_forward(x, layers_bf16, head_bf16)
    np.testing.assert_allclose(np.asarray(feat_b), np.asarray(ref_feat_b),
                               rtol=3e-2, atol=3e-2)
    np.testing.assert_allclose(np.asarray(final_b), np.asarray(ref_final_b),
                               rtol=3e-2, atol=3e-2)

    assert final_x.shape == (B, 1) and feat.shape == (B, num_nodes[-1])
    print("KERNEL_OK")
</pallas_src>

<mosaic_0001>
module attributes {stable_mosaic.version = 11 : i64} {
  func.func @kernel(%arg0: i32, %arg1: memref<8x256xf32, #tpu.memory_space<vmem>>, %arg2: memref<256x256xf32, #tpu.memory_space<vmem>>, %arg3: memref<1x256xf32, #tpu.memory_space<vmem>>, %arg4: memref<256x128xf32, #tpu.memory_space<vmem>>, %arg5: memref<1x128xf32, #tpu.memory_space<vmem>>, %arg6: memref<128x128xf32, #tpu.memory_space<vmem>>, %arg7: memref<1x128xf32, #tpu.memory_space<vmem>>, %arg8: memref<1x128xf32, #tpu.memory_space<vmem>>, %arg9: memref<1x128xf32, #tpu.memory_space<vmem>>, %arg10: memref<128x128xf32, #tpu.memory_space<vmem>>, %arg11: memref<1x128xf32, #tpu.memory_space<vmem>>, %arg12: memref<8x128xf32, #tpu.memory_space<vmem>>, %arg13: memref<8x128xf32, #tpu.memory_space<vmem>>) attributes {dimension_semantics = [#tpu.dimension_semantics<parallel>], iteration_bounds = array<i64: 1>, scalar_prefetch = 0 : i64, scratch_operands = 0 : i64, tpu.core_type = #tpu.core_type<tc>, window_params = [{transform_indices = @transform_0, window_bounds = array<i64: 8, 256>}, {pipeline_mode = #tpu.pipeline_mode<synchronous>, transform_indices = @transform_1, window_bounds = array<i64: 256, 256>}, {pipeline_mode = #tpu.pipeline_mode<synchronous>, transform_indices = @transform_2, window_bounds = array<i64: 1, 256>}, {pipeline_mode = #tpu.pipeline_mode<synchronous>, transform_indices = @transform_3, window_bounds = array<i64: 256, 128>}, {pipeline_mode = #tpu.pipeline_mode<synchronous>, transform_indices = @transform_4, window_bounds = array<i64: 1, 128>}, {pipeline_mode = #tpu.pipeline_mode<synchronous>, transform_indices = @transform_5, window_bounds = array<i64: 128, 128>}, {pipeline_mode = #tpu.pipeline_mode<synchronous>, transform_indices = @transform_6, window_bounds = array<i64: 1, 128>}, {pipeline_mode = #tpu.pipeline_mode<synchronous>, transform_indices = @transform_7, window_bounds = array<i64: 1, 128>}, {pipeline_mode = #tpu.pipeline_mode<synchronous>, transform_indices = @transform_8, window_bounds = array<i64: 1, 128>}, {pipeline_mode = #tpu.pipeline_mode<synchronous>, transform_indices = @transform_9, window_bounds = array<i64: 128, 128>}, {pipeline_mode = #tpu.pipeline_mode<synchronous>, transform_indices = @transform_10, window_bounds = array<i64: 1, 128>}, {transform_indices = @transform_11, window_bounds = array<i64: 8, 128>}, {transform_indices = @transform_12, window_bounds = array<i64: 8, 128>}]} {
    %c0 = arith.constant 0 : index
    %c0_0 = arith.constant 0 : index
    %0 = vector.load %arg1[%c0, %c0_0] : memref<8x256xf32, #tpu.memory_space<vmem>>, vector<8x256xf32>
    %c0_1 = arith.constant 0 : index
    %c0_2 = arith.constant 0 : index
    %1 = vector.load %arg2[%c0_1, %c0_2] : memref<256x256xf32, #tpu.memory_space<vmem>>, vector<256x256xf32>
    %cst = arith.constant dense<0.000000e+00> : vector<8x256xf32>
    %2 = tpu.matmul %0, %1, %cst {dimension_numbers = #tpu.dot_dimension_numbers<[1], [0], [0], [1], [0, 0, 1, 1], [], []>} : vector<8x256xf32>, vector<256x256xf32>, vector<8x256xf32> -> vector<8x256xf32>
    %c0_3 = arith.constant 0 : index
    %c0_4 = arith.constant 0 : index
    %3 = vector.load %arg3[%c0_3, %c0_4] : memref<1x256xf32, #tpu.memory_space<vmem>>, vector<1x256xf32>
    %4 = vector.broadcast %3 : vector<1x256xf32> to vector<8x256xf32>
    %5 = arith.addf %2, %4 : vector<8x256xf32>
    %cst_5 = arith.constant 0.000000e+00 : f32
    %6 = vector.broadcast %cst_5 : f32 to vector<8x256xf32>
    %7 = arith.maximumf %5, %6 : vector<8x256xf32>
    %c0_6 = arith.constant 0 : index
    %c0_7 = arith.constant 0 : index
    %8 = vector.load %arg4[%c0_6, %c0_7] : memref<256x128xf32, #tpu.memory_space<vmem>>, vector<256x128xf32>
    %cst_8 = arith.constant dense<0.000000e+00> : vector<8x128xf32>
    %9 = tpu.matmul %7, %8, %cst_8 {dimension_numbers = #tpu.dot_dimension_numbers<[1], [0], [0], [1], [0, 0, 1, 1], [], []>} : vector<8x256xf32>, vector<256x128xf32>, vector<8x128xf32> -> vector<8x128xf32>
    %c0_9 = arith.constant 0 : index
    %c0_10 = arith.constant 0 : index
    %10 = vector.load %arg5[%c0_9, %c0_10] : memref<1x128xf32, #tpu.memory_space<vmem>>, vector<1x128xf32>
    %11 = vector.broadcast %10 : vector<1x128xf32> to vector<8x128xf32>
    %12 = arith.addf %9, %11 : vector<8x128xf32>
    %cst_11 = arith.constant 0.000000e+00 : f32
    %13 = vector.broadcast %cst_11 : f32 to vector<8x128xf32>
    %14 = arith.maximumf %12, %13 : vector<8x128xf32>
    %c0_12 = arith.constant 0 : index
    %c0_13 = arith.constant 0 : index
    %15 = vector.load %arg6[%c0_12, %c0_13] : memref<128x128xf32, #tpu.memory_space<vmem>>, vector<128x128xf32>
    %cst_14 = arith.constant dense<0.000000e+00> : vector<8x128xf32>
    %16 = tpu.matmul %14, %15, %cst_14 {dimension_numbers = #tpu.dot_dimension_numbers<[1], [0], [0], [1], [0, 0, 1, 1], [], []>} : vector<8x128xf32>, vector<128x128xf32>, vector<8x128xf32> -> vector<8x128xf32>
    %c0_15 = arith.constant 0 : index
    %c0_16 = arith.constant 0 : index
    %17 = vector.load %arg7[%c0_15, %c0_16] : memref<1x128xf32, #tpu.memory_space<vmem>>, vector<1x128xf32>
    %18 = vector.broadcast %17 : vector<1x128xf32> to vector<8x128xf32>
    %19 = arith.addf %16, %18 : vector<8x128xf32>
    %cst_17 = arith.constant 0.000000e+00 : f32
    %20 = vector.broadcast %cst_17 : f32 to vector<8x128xf32>
    %21 = arith.maximumf %19, %20 : vector<8x128xf32>
    %c0_18 = arith.constant 0 : index
    %c0_19 = arith.constant 0 : index
    %22 = vector.load %arg8[%c0_18, %c0_19] : memref<1x128xf32, #tpu.memory_space<vmem>>, vector<1x128xf32>
    %23 = vector.broadcast %22 : vector<1x128xf32> to vector<8x128xf32>
    %24 = arith.mulf %21, %23 : vector<8x128xf32>
    %c0_20 = arith.constant 0 : index
    %c0_21 = arith.constant 0 : index
    %25 = vector.load %arg9[%c0_20, %c0_21] : memref<1x128xf32, #tpu.memory_space<vmem>>, vector<1x128xf32>
    %26 = vector.broadcast %25 : vector<1x128xf32> to vector<8x128xf32>
    %27 = arith.addf %24, %26 : vector<8x128xf32>
    %c0_22 = arith.constant 0 : index
    %c0_23 = arith.constant 0 : index
    %28 = vector.load %arg12[%c0_22, %c0_23] : memref<8x128xf32, #tpu.memory_space<vmem>>, vector<8x128xf32>
    tpu.vector_store %arg12[%c0_22, %c0_23], %27 {strides = array<i32>} : memref<8x128xf32, #tpu.memory_space<vmem>>, vector<8x128xf32>,
    %c0_24 = arith.constant 0 : index
    %c0_25 = arith.constant 0 : index
    %29 = vector.load %arg10[%c0_24, %c0_25] : memref<128x128xf32, #tpu.memory_space<vmem>>, vector<128x128xf32>
    %cst_26 = arith.constant dense<0.000000e+00> : vector<8x128xf32>
    %30 = tpu.matmul %27, %29, %cst_26 {dimension_numbers = #tpu.dot_dimension_numbers<[1], [0], [0], [1], [0, 0, 1, 1], [], []>} : vector<8x128xf32>, vector<128x128xf32>, vector<8x128xf32> -> vector<8x128xf32>
    %c0_27 = arith.constant 0 : index
    %c0_28 = arith.constant 0 : index
    %31 = vector.load %arg11[%c0_27, %c0_28] : memref<1x128xf32, #tpu.memory_space<vmem>>, vector<1x128xf32>
    %32 = vector.broadcast %31 : vector<1x128xf32> to vector<8x128xf32>
    %33 = arith.addf %30, %32 : vector<8x128xf32>
    %cst_29 = arith.constant 0.000000e+00 : f32
    %34 = vector.broadcast %cst_29 : f32 to vector<8x128xf32>
    %35 = arith.subf %34, %33 : vector<8x128xf32>
    %36 = math.exp %35 : vector<8x128xf32>
    %cst_30 = arith.constant 1.000000e+00 : f32
    %37 = vector.broadcast %cst_30 : f32 to vector<8x128xf32>
    %38 = arith.addf %37, %36 : vector<8x128xf32>
    %39 = tpu.reciprocal %38 {approx = true} : vector<8x128xf32> -> vector<8x128xf32>
    %c0_31 = arith.constant 0 : index
    %c0_32 = arith.constant 0 : index
    %40 = vector.load %arg13[%c0_31, %c0_32] : memref<8x128xf32, #tpu.memory_space<vmem>>, vector<8x128xf32>
    tpu.vector_store %arg13[%c0_31, %c0_32], %39 {strides = array<i32>} : memref<8x128xf32, #tpu.memory_space<vmem>>, vector<8x128xf32>,
    return
  }
  func.func @transform_0(%arg0: i32) -> (i32, i32) {
    %c0_i32 = arith.constant 0 : i32
    %c0_i32_0 = arith.constant 0 : i32
    return %arg0, %c0_i32 : i32, i32
  }
  func.func @transform_1(%arg0: i32) -> (i32, i32) {
    %c0_i32 = arith.constant 0 : i32
    %c0_i32_0 = arith.constant 0 : i32
    %c0_i32_1 = arith.constant 0 : i32
    return %c0_i32, %c0_i32_0 : i32, i32
  }
  func.func @transform_2(%arg0: i32) -> (i32, i32) {
    %c0_i32 = arith.constant 0 : i32
    %c0_i32_0 = arith.constant 0 : i32
    %c0_i32_1 = arith.constant 0 : i32
    return %c0_i32, %c0_i32_0 : i32, i32
  }
  func.func @transform_3(%arg0: i32) -> (i32, i32) {
    %c0_i32 = arith.constant 0 : i32
    %c0_i32_0 = arith.constant 0 : i32
    %c0_i32_1 = arith.constant 0 : i32
    return %c0_i32, %c0_i32_0 : i32, i32
  }
  func.func @transform_4(%arg0: i32) -> (i32, i32) {
    %c0_i32 = arith.constant 0 : i32
    %c0_i32_0 = arith.constant 0 : i32
    %c0_i32_1 = arith.constant 0 : i32
    return %c0_i32, %c0_i32_0 : i32, i32
  }
  func.func @transform_5(%arg0: i32) -> (i32, i32) {
    %c0_i32 = arith.constant 0 : i32
    %c0_i32_0 = arith.constant 0 : i32
    %c0_i32_1 = arith.constant 0 : i32
    return %c0_i32, %c0_i32_0 : i32, i32
  }
  func.func @transform_6(%arg0: i32) -> (i32, i32) {
    %c0_i32 = arith.constant 0 : i32
    %c0_i32_0 = arith.constant 0 : i32
    %c0_i32_1 = arith.constant 0 : i32
    return %c0_i32, %c0_i32_0 : i32, i32
  }
  func.func @transform_7(%arg0: i32) -> (i32, i32) {
    %c0_i32 = arith.constant 0 : i32
    %c0_i32_0 = arith.constant 0 : i32
    %c0_i32_1 = arith.constant 0 : i32
    return %c0_i32, %c0_i32_0 : i32, i32
  }
  func.func @transform_8(%arg0: i32) -> (i32, i32) {
    %c0_i32 = arith.constant 0 : i32
    %c0_i32_0 = arith.constant 0 : i32
    %c0_i32_1 = arith.constant 0 : i32
    return %c0_i32, %c0_i32_0 : i32, i32
  }
  func.func @transform_9(%arg0: i32) -> (i32, i32) {
    %c0_i32 = arith.constant 0 : i32
    %c0_i32_0 = arith.constant 0 : i32
    %c0_i32_1 = arith.constant 0 : i32
    return %c0_i32, %c0_i32_0 : i32, i32
  }
  func.func @transform_10(%arg0: i32) -> (i32, i32) {
    %c0_i32 = arith.constant 0 : i32
    %c0_i32_0 = arith.constant 0 : i32
    %c0_i32_1 = arith.constant 0 : i32
    return %c0_i32, %c0_i32_0 : i32, i32
  }
  func.func @transform_11(%arg0: i32) -> (i32, i32) {
    %c0_i32 = arith.constant 0 : i32
    %c0_i32_0 = arith.constant 0 : i32
    return %arg0, %c0_i32 : i32, i32
  }
  func.func @transform_12(%arg0: i32) -> (i32, i32) {
    %c0_i32 = arith.constant 0 : i32
    %c0_i32_0 = arith.constant 0 : i32
    return %arg0, %c0_i32 : i32, i32
  }
}

</mosaic_0001>

<bundles_post_ra>
// kernel: _forward_impl.1
= control target key start
LH: loop header
LB: loop body
LE: loop exit
PB: predicated region body
PF: predicated region fallthrough
CT: control target
= control target key end

     0   :  { %s1219_s0 = inlined_call_operand.vmem [shape: f32[8,256], index: 0, kind: input, shape index: {}]   ;;  %s1220_s1 = inlined_call_operand.vmem [shape: f32[256,256], index: 1, kind: input, shape index: {}]   ;;  %s1221_s2 = inlined_call_operand.vmem [shape: f32[1,256], index: 2, kind: input, shape index: {}]   ;;  %s1222_s3 = inlined_call_operand.vmem [shape: f32[256,128], index: 3, kind: input, shape index: {}]   ;;  %s1223_s4 = inlined_call_operand.vmem [shape: f32[1,128], index: 4, kind: input, shape index: {}]   ;;  %s1224_s5 = inlined_call_operand.vmem [shape: f32[128,128], index: 5, kind: input, shape index: {}]   ;;  %s1225_s6 = inlined_call_operand.vmem [shape: f32[1,128], index: 6, kind: input, shape index: {}]   ;;  %s1226_s7 = inlined_call_operand.vmem [shape: f32[1,128], index: 7, kind: input, shape index: {}]   ;;  %s1227_s8 = inlined_call_operand.vmem [shape: f32[1,128], index: 8, kind: input, shape index: {}]   ;;  %s1228_s9 = inlined_call_operand.vmem [shape: f32[128,128], index: 9, kind: input, shape index: {}]   ;;  %s1229_s10 = inlined_call_operand.vmem [shape: f32[1,128], index: 10, kind: input, shape index: {}]   ;;  %s1230_s11 = inlined_call_operand.hbm [shape: f32[8,128], index: 11, kind: output, shape index: {0}]   ;;  %s1231_s12 = inlined_call_operand.vmem [shape: f32[8,128], index: 12, kind: output, shape index: {1}]  }
   0x1   :  { %v74_v0 = vld [vmem:[%s1220_s1 + $0xf8] sm:$0xff]  ;;  %v73_v1 = vld [vmem:[%s1220_s1 + $0xf0] sm:$0xff]  ;;  %v72_v2 = vld [vmem:[%s1220_s1 + $0xe8] sm:$0xff] }
   0x2   :  { %119 = vmatprep.subr.mxu0 %v74_v0  ;;  %v71_v3 = vld [vmem:[%s1220_s1 + $0xe0] sm:$0xff]  ;;  %v70_v4 = vld [vmem:[%s1220_s1 + $0xd8] sm:$0xff]  ;;  %v69_v5 = vld [vmem:[%s1220_s1 + $0xd0] sm:$0xff] }
   0x3   :  { %120 = vmatpush1.msra.mxu0 %v73_v1  ;;  %v68_v6 = vld [vmem:[%s1220_s1 + $0xc8] sm:$0xff]  ;;  %v67_v7 = vld [vmem:[%s1220_s1 + $0xc0] sm:$0xff]  ;;  %v66_v8 = vld [vmem:[%s1220_s1 + $0xb8] sm:$0xff] }
   0x4   :  { %121 = vmatprep.subr.mxu0 %v72_v2  ;;  %v65_v9 = vld [vmem:[%s1220_s1 + $0xb0] sm:$0xff]  ;;  %v64_v10 = vld [vmem:[%s1220_s1 + $0xa8] sm:$0xff]  ;;  %v63_v11 = vld [vmem:[%s1220_s1 + $0xa0] sm:$0xff] }
   0x5   :  { %122 = vmatpush1.msra.mxu0 %v71_v3  ;;  %v62_v12 = vld [vmem:[%s1220_s1 + $0x98] sm:$0xff]  ;;  %v61_v13 = vld [vmem:[%s1220_s1 + $0x90] sm:$0xff]  ;;  %v60_v14 = vld [vmem:[%s1220_s1 + $0x88] sm:$0xff] }
   0x6   :  { %123 = vmatprep.subr.mxu0 %v70_v4  ;;  %v59_v15 = vld [vmem:[%s1220_s1 + $0x80] sm:$0xff]  ;;  %v58_v16 = vld [vmem:[%s1220_s1 + $0x78] sm:$0xff]  ;;  %v57_v17 = vld [vmem:[%s1220_s1 + $0x70] sm:$0xff] }
   0x7   :  { %124 = vmatpush1.msra.mxu0 %v69_v5  ;;  %v56_v18 = vld [vmem:[%s1220_s1 + $0x68] sm:$0xff]  ;;  %v55_v19 = vld [vmem:[%s1220_s1 + $0x60] sm:$0xff]  ;;  %v54_v20 = vld [vmem:[%s1220_s1 + $0x58] sm:$0xff] }
   0x8   :  { %125 = vmatprep.subr.mxu0 %v68_v6  ;;  %v53_v21 = vld [vmem:[%s1220_s1 + $0x50] sm:$0xff]  ;;  %v52_v22 = vld [vmem:[%s1220_s1 + $0x48] sm:$0xff]  ;;  %v51_v23 = vld [vmem:[%s1220_s1 + $0x40] sm:$0xff] }
   0x9   :  { %126 = vmatpush1.msra.mxu0 %v67_v7  ;;  %v50_v24 = vld [vmem:[%s1220_s1 + $0x38] sm:$0xff]  ;;  %v42_v25 = vld [vmem:[%s1219_s0 + $0x8] sm:$0xff]  ;;  %v222_v28 = vld [vmem:[%s1222_s3 + $0xf0] sm:$0xff] }
   0xa   :  { %127 = vmatprep.subr.mxu0 %v66_v8  ;;  %183 = vmatprep.mubr.f32.mxu0 %v42_v25  ;;  %v223_v26 = vld [vmem:[%s1222_s3 + $0xf8] sm:$0xff]  ;;  %v49_v29 = vld [vmem:[%s1220_s1 + $0x30] sm:$0xff]  ;;  %v48_v31 = vld [vmem:[%s1220_s1 + $0x28] sm:$0xff] }
   0xb   :  { %128 = vmatpush1.msra.mxu0 %v65_v9  ;;  %v207_v27 = vld [vmem:[%s1222_s3 + $0x78] sm:$0xff]  ;;  %535 = vmatprep.subr.mxu1 %v223_v26  ;;  %v206_v30 = vld [vmem:[%s1222_s3 + $0x70] sm:$0xff]  ;;  %v221_v32 = vld [vmem:[%s1222_s3 + $0xe8] sm:$0xff] }
   0xc   :  { %129 = vmatprep.subr.mxu0 %v64_v10  ;;  %536 = vmatpush3.msra.mxu1 %v207_v27  ;;  %v47_v33 = vld [vmem:[%s1220_s1 + $0x20] sm:$0xff]  ;;  %v205_v34 = vld [vmem:[%s1222_s3 + $0x68] sm:$0xff]  ;;  %v46_v35 = vld [vmem:[%s1220_s1 + $0x18] sm:$0xff] }
   0xd   :  { %130 = vmatpush1.msra.mxu0 %v63_v11  ;;  %537 = vmatprep.subr.mxu1 %v222_v28  ;;  %v220_v36 = vld [vmem:[%s1222_s3 + $0xe0] sm:$0xff]  ;;  %v45_v37 = vld [vmem:[%s1220_s1 + $0x10] sm:$0xff]  ;;  %v44_v39 = vld [vmem:[%s1220_s1 + $0x8] sm:$0xff] }
   0xe   :  { %131 = vmatprep.subr.mxu0 %v62_v12  ;;  %538 = vmatpush3.msra.mxu1 %v206_v30  ;;  %v204_v38 = vld [vmem:[%s1222_s3 + $0x60] sm:$0xff]  ;;  %v219_v40 = vld [vmem:[%s1222_s3 + $0xd8] sm:$0xff]  ;;  %v218_v44 = vld [vmem:[%s1222_s3 + $0xd0] sm:$0xff] }
   0xf   :  { %132 = vmatpush1.msra.mxu0 %v61_v13  ;;  %539 = vmatprep.subr.mxu1 %v221_v32  ;;  %v43_v41 = vld [vmem:[%s1220_s1] sm:$0xff]  ;;  %v203_v42 = vld [vmem:[%s1222_s3 + $0x58] sm:$0xff] }
  0x10   :  { %133 = vmatprep.subr.mxu0 %v60_v14  ;;  %540 = vmatpush3.msra.mxu1 %v205_v34  ;;  %v106_v43 = vld [vmem:[%s1220_s1 + $0x1f8] sm:$0xff] }
  0x11   :  { %134 = vmatpush1.msra.mxu0 %v59_v15  ;;  %541 = vmatprep.subr.mxu1 %v220_v36 }
  0x12   :  { %135 = vmatprep.subr.mxu0 %v58_v16  ;;  %542 = vmatpush3.msra.mxu1 %v204_v38 }
  0x13   :  { %136 = vmatpush1.msra.mxu0 %v57_v17 }
  0x14   :  { %137 = vmatprep.subr.mxu0 %v56_v18 }
  0x15   :  { %138 = vmatpush1.msra.mxu0 %v55_v19 }
  0x16   :  { %139 = vmatprep.subr.mxu0 %v54_v20 }
  0x17   :  { %140 = vmatpush1.msra.mxu0 %v53_v21 }
  0x18   :  { %141 = vmatprep.subr.mxu0 %v52_v22 }
  0x19   :  { %142 = vmatpush1.msra.mxu0 %v51_v23 }
  0x1a   :  { %143 = vmatprep.subr.mxu0 %v50_v24 }
  0x1b   :  { %144 = vmatpush1.msra.mxu0 %v49_v29 }
  0x1c   :  { %145 = vmatprep.subr.mxu0 %v48_v31 }
  0x1d   :  { %146 = vmatpush1.msra.mxu0 %v47_v33 }
  0x1e   :  { %147 = vmatprep.subr.mxu0 %v46_v35 }
  0x1f   :  { %148 = vmatpush1.msra.mxu0 %v45_v37 }
  0x20   :  { %18 = vsyncpa [#allocation3], 0  ;;  %149 = vmatprep.subr.mxu0 %v44_v39  ;;  %v105_v45 = vld [vmem:[%s1220_s1 + $0x1f0] sm:$0xff]  ;;  %543 = vmatprep.subr.mxu1 %v219_v40  ;;  %v104_v47 = vld [vmem:[%s1220_s1 + $0x1e8] sm:$0xff]  ;;  %v703_v34 = vmov 0.0   ;;  %v109_v35 = vlaneseq  ;;  %vm704_vm0 = vmmov 0  }
  0x21   :  { %v202_v46 = vld [vmem:[%s1222_s3 + $0x50] sm:$0xff]  ;;  %150 = vmatpush1.msra.mxu0 %v43_v41  ;;  %544 = vmatpush3.msra.mxu1 %v203_v42  ;;  %v217_v48 = vld [vmem:[%s1222_s3 + $0xc8] sm:$0xff]  ;;  %v103_v49 = vld [vmem:[%s1220_s1 + $0x1e0] sm:$0xff] }
  0x22   :  { %151 = vmatprep.subr.mxu0 %v106_v43  ;;  %545 = vmatprep.subr.mxu1 %v218_v44  ;;  %v201_v50 = vld [vmem:[%s1222_s3 + $0x48] sm:$0xff]  ;;  %v102_v51 = vld [vmem:[%s1220_s1 + $0x1d8] sm:$0xff]  ;;  %v216_v52 = vld [vmem:[%s1222_s3 + $0xc0] sm:$0xff]  ;;  %v110_v36 = vshrl.u32 %v109_v35, 7 }
  0x23   :  { %152 = vmatpush2.msra.mxu0 %v105_v45  ;;  %546 = vmatpush3.msra.mxu1 %v202_v46  ;;  %v101_v53 = vld [vmem:[%s1220_s1 + $0x1d0] sm:$0xff]  ;;  %v200_v54 = vld [vmem:[%s1222_s3 + $0x40] sm:$0xff]  ;;  %v100_v55 = vld [vmem:[%s1220_s1 + $0x1c8] sm:$0xff] }
  0x24   :  { %153 = vmatprep.subr.mxu0 %v104_v47  ;;  %547 = vmatprep.subr.mxu1 %v217_v48  ;;  %v215_v56 = vld [vmem:[%s1222_s3 + $0xb8] sm:$0xff]  ;;  %v99_v57 = vld [vmem:[%s1220_s1 + $0x1c0] sm:$0xff]  ;;  %v214_v60 = vld [vmem:[%s1222_s3 + $0xb0] sm:$0xff]  ;;  %v111_v37 = vsub.s32 0, %v110_v36  ;;  %v115_v39 = vsub.s32 1, %v110_v36 }
  0x25   :  { %154 = vmatpush2.msra.mxu0 %v103_v49  ;;  %548 = vmatpush3.msra.mxu1 %v201_v50  ;;  %v199_v58 = vld [vmem:[%s1222_s3 + $0x38] sm:$0xff]  ;;  %v97_v61 = vld [vmem:[%s1220_s1 + $0x1b0] sm:$0xff]  ;;  %v96_v63 = vld [vmem:[%s1220_s1 + $0x1a8] sm:$0xff] }
  0x26   :  { %155 = vmatprep.subr.mxu0 %v102_v51  ;;  %549 = vmatprep.subr.mxu1 %v216_v52  ;;  %v98_v59 = vld [vmem:[%s1220_s1 + $0x1b8] sm:$0xff]  ;;  %v198_v62 = vld [vmem:[%s1222_s3 + $0x30] sm:$0xff]  ;;  %v213_v0 = vld [vmem:[%s1222_s3 + $0xa8] sm:$0xff] }
  0x27   :  { %156 = vmatpush2.msra.mxu0 %v101_v53  ;;  %550 = vmatpush3.msra.mxu1 %v200_v54  ;;  %v95_v1 = vld [vmem:[%s1220_s1 + $0x1a0] sm:$0xff]  ;;  %v197_v2 = vld [vmem:[%s1222_s3 + $0x28] sm:$0xff]  ;;  %v94_v3 = vld [vmem:[%s1220_s1 + $0x198] sm:$0xff] }
  0x28   :  { %157 = vmatprep.subr.mxu0 %v100_v55  ;;  %551 = vmatprep.subr.mxu1 %v215_v56  ;;  %v212_v4 = vld [vmem:[%s1222_s3 + $0xa0] sm:$0xff]  ;;  %v93_v5 = vld [vmem:[%s1220_s1 + $0x190] sm:$0xff]  ;;  %v92_v7 = vld [vmem:[%s1220_s1 + $0x188] sm:$0xff] }
  0x29   :  { %158 = vmatpush2.msra.mxu0 %v99_v57  ;;  %552 = vmatpush3.msra.mxu1 %v199_v58  ;;  %v196_v6 = vld [vmem:[%s1222_s3 + $0x20] sm:$0xff]  ;;  %v90_v9 = vld [vmem:[%s1220_s1 + $0x178] sm:$0xff]  ;;  %v89_v10 = vld [vmem:[%s1220_s1 + $0x170] sm:$0xff] }
  0x2a   :  { %159 = vmatprep.subr.mxu0 %v98_v59  ;;  %553 = vmatprep.subr.mxu1 %v214_v60  ;;  %v91_v8 = vld [vmem:[%s1220_s1 + $0x180] sm:$0xff]  ;;  %v88_v11 = vld [vmem:[%s1220_s1 + $0x168] sm:$0xff]  ;;  %v86_v13 = vld [vmem:[%s1220_s1 + $0x158] sm:$0xff] }
  0x2b   :  { %160 = vmatpush2.msra.mxu0 %v97_v61  ;;  %554 = vmatpush3.msra.mxu1 %v198_v62  ;;  %v87_v12 = vld [vmem:[%s1220_s1 + $0x160] sm:$0xff]  ;;  %v85_v14 = vld [vmem:[%s1220_s1 + $0x150] sm:$0xff]  ;;  %v84_v15 = vld [vmem:[%s1220_s1 + $0x148] sm:$0xff] }
  0x2c   :  { %161 = vmatprep.subr.mxu0 %v96_v63  ;;  %555 = vmatprep.subr.mxu1 %v213_v0  ;;  %v83_v16 = vld [vmem:[%s1220_s1 + $0x140] sm:$0xff]  ;;  %v82_v17 = vld [vmem:[%s1220_s1 + $0x138] sm:$0xff]  ;;  %v81_v18 = vld [vmem:[%s1220_s1 + $0x130] sm:$0xff] }
  0x2d   :  { %162 = vmatpush2.msra.mxu0 %v95_v1  ;;  %556 = vmatpush3.msra.mxu1 %v197_v2  ;;  %v80_v19 = vld [vmem:[%s1220_s1 + $0x128] sm:$0xff]  ;;  %v79_v20 = vld [vmem:[%s1220_s1 + $0x120] sm:$0xff]  ;;  %v78_v21 = vld [vmem:[%s1220_s1 + $0x118] sm:$0xff] }
  0x2e   :  { %163 = vmatprep.subr.mxu0 %v94_v3  ;;  %557 = vmatprep.subr.mxu1 %v212_v4  ;;  %v77_v22 = vld [vmem:[%s1220_s1 + $0x110] sm:$0xff]  ;;  %v76_v23 = vld [vmem:[%s1220_s1 + $0x108] sm:$0xff]  ;;  %v75_v24 = vld [vmem:[%s1220_s1 + $0x100] sm:$0xff] }
  0x2f   :  { %164 = vmatpush2.msra.mxu0 %v93_v5  ;;  %558 = vmatpush3.msra.mxu1 %v196_v6  ;;  %v41_v25 = vld [vmem:[%s1219_s0] sm:$0xff]  ;;  %v211_v26 = vld [vmem:[%s1222_s3 + $0x98] sm:$0xff]  ;;  %v210_v28 = vld [vmem:[%s1222_s3 + $0x90] sm:$0xff] }
  0x30   :  { %165 = vmatprep.subr.mxu0 %v92_v7  ;;  %559 = vmatprep.subr.mxu1 %v211_v26  ;;  %v195_v27 = vld [vmem:[%s1222_s3 + $0x18] sm:$0xff]  ;;  %v194_v29 = vld [vmem:[%s1222_s3 + $0x10] sm:$0xff]  ;;  %v209_v30 = vld [vmem:[%s1222_s3 + $0x88] sm:$0xff] }
  0x31   :  { %166 = vmatpush2.msra.mxu0 %v91_v8  ;;  %560 = vmatpush3.msra.mxu1 %v195_v27  ;;  %v193_v31 = vld [vmem:[%s1222_s3 + $0x8] sm:$0xff]  ;;  %v208_v32 = vld [vmem:[%s1222_s3 + $0x80] sm:$0xff]  ;;  %v317_v48 = vld [vmem:[%s1224_s5 + $0x78] sm:$0xff] }
  0x32   :  { %167 = vmatprep.subr.mxu0 %v90_v9  ;;  %561 = vmatprep.subr.mxu1 %v210_v28  ;;  %v192_v33 = vld [vmem:[%s1222_s3] sm:$0xff]  ;;  %v316_v49 = vld [vmem:[%s1224_s5 + $0x70] sm:$0xff]  ;;  %v315_v50 = vld [vmem:[%s1224_s5 + $0x68] sm:$0xff] }
  0x33   :  { %168 = vmatpush2.msra.mxu0 %v89_v10  ;;  %562 = vmatpush3.msra.mxu1 %v194_v29  ;;  %v107_v38 = vld [vmem:[%s1221_s2] sm:$0x3]  ;;  %v313_v52 = vld [vmem:[%s1224_s5 + $0x58] sm:$0xff]  ;;  %v312_v53 = vld [vmem:[%s1224_s5 + $0x50] sm:$0xff] }
  0x34   :  { %169 = vmatprep.subr.mxu0 %v88_v11  ;;  %563 = vmatprep.subr.mxu1 %v209_v30  ;;  %v112_v40 = vrot.slane %v107_v38, %v111_v37  ;;  %v116_v41 = vrot.slane %v107_v38, %v115_v39  ;;  %v314_v51 = vld [vmem:[%s1224_s5 + $0x60] sm:$0xff]  ;;  %v311_v54 = vld [vmem:[%s1224_s5 + $0x48] sm:$0xff]  ;;  %v309_v56 = vld [vmem:[%s1224_s5 + $0x38] sm:$0xff] }
  0x35   :  { %170 = vmatpush2.msra.mxu0 %v87_v12  ;;  %564 = vmatpush3.msra.mxu1 %v193_v31  ;;  %v310_v55 = vld [vmem:[%s1224_s5 + $0x40] sm:$0xff]  ;;  %v308_v57 = vld [vmem:[%s1224_s5 + $0x30] sm:$0xff]  ;;  %v307_v58 = vld [vmem:[%s1224_s5 + $0x28] sm:$0xff] }
  0x36   :  { %171 = vmatprep.subr.mxu0 %v86_v13  ;;  %565 = vmatprep.subr.mxu1 %v208_v32  ;;  %v306_v59 = vld [vmem:[%s1224_s5 + $0x20] sm:$0xff]  ;;  %v305_v60 = vld [vmem:[%s1224_s5 + $0x18] sm:$0xff]  ;;  %v304_v61 = vld [vmem:[%s1224_s5 + $0x10] sm:$0xff] }
  0x37   :  { %172 = vmatpush2.msra.mxu0 %v85_v14  ;;  %566 = vmatpush3.msra.mxu1 %v192_v33  ;;  %v303_v62 = vld [vmem:[%s1224_s5 + $0x8] sm:$0xff]  ;;  %v302_v63 = vld [vmem:[%s1224_s5] sm:$0xff]  ;;  %v428_v0 = vld [vmem:[%s1228_s9 + $0x78] sm:$0xff] }
  0x38   :  { %173 = vmatprep.subr.mxu0 %v84_v15  ;;  %604 = vmatprep.subr.mxu1 %v703_v34  ;;  %v427_v1 = vld [vmem:[%s1228_s9 + $0x70] sm:$0xff]  ;;  %v426_v2 = vld [vmem:[%s1228_s9 + $0x68] sm:$0xff]  ;;  %v425_v3 = vld [vmem:[%s1228_s9 + $0x60] sm:$0xff] }
  0x39   :  { %174 = vmatpush2.msra.mxu0 %v83_v16  ;;  %v424_v4 = vld [vmem:[%s1228_s9 + $0x58] sm:$0xff]  ;;  %v423_v5 = vld [vmem:[%s1228_s9 + $0x50] sm:$0xff]  ;;  %v422_v6 = vld [vmem:[%s1228_s9 + $0x48] sm:$0xff] }
  0x3a   :  { %175 = vmatprep.subr.mxu0 %v82_v17  ;;  %v421_v7 = vld [vmem:[%s1228_s9 + $0x40] sm:$0xff]  ;;  %v420_v8 = vld [vmem:[%s1228_s9 + $0x38] sm:$0xff]  ;;  %v419_v9 = vld [vmem:[%s1228_s9 + $0x30] sm:$0xff] }
  0x3b   :  { %176 = vmatpush2.msra.mxu0 %v81_v18  ;;  %v418_v10 = vld [vmem:[%s1228_s9 + $0x28] sm:$0xff]  ;;  %v530_v12 = vld [vmem:[%s1223_s4] ss:$0 sm:$0xff]  ;;  %v416_v18 = vld [vmem:[%s1228_s9 + $0x18] sm:$0xff] }
  0x3c   :  { %177 = vmatprep.subr.mxu0 %v80_v19  ;;  %v417_v17 = vld [vmem:[%s1228_s9 + $0x20] sm:$0xff]  ;;  %v415_v19 = vld [vmem:[%s1228_s9 + $0x10] sm:$0xff] }
  0x3d   :  { %178 = vmatpush2.msra.mxu0 %v79_v20  ;;  %v414_v20 = vld [vmem:[%s1228_s9 + $0x8] sm:$0xff]  ;;  %v533_v28 = vld [vmem:[%s1227_s8] ss:$0 sm:$0xff] }
  0x3e   :  { %179 = vmatprep.subr.mxu0 %v78_v21  ;;  %v413_v21 = vld [vmem:[%s1228_s9] sm:$0xff]  ;;  %s705_s9 = smov [#allocation2]  }
  0x3f   :  { %180 = vmatpush2.msra.mxu0 %v77_v22  ;;  %v531_v22 = vld [vmem:[%s1225_s6] ss:$0 sm:$0xff]  ;;  %s518_s21 = sshll.u32 %s705_s9, 4  ;;  %s519_s21 = int_to_ptr.vmem [resolvable:$true] %s518_s21 }
  0x40   :  { %181 = vmatprep.subr.mxu0 %v76_v23  ;;  %s681_s6 = scalar_lea.vmem %s519_s21, 128  ;;  %p686_p1 = scmp.lt.s32.totalorder %s519_s21, %s519_s21 }
  0x41   :  { %182 = vmatpush2.msra.mxu0 %v75_v24  ;;  %p682_p0 = scmp.ne.s32.totalorder %s519_s21, %s681_s6  ;;  %p687_p2 = scmp.lt.s32.totalorder %s681_s6, %s681_s6 }
  0x42   :  { %184 = vmatmul.mubr.f32.vlgmr.msra.gmra.mxu0 %v41_v25  ;;  %639 = vmatprep.subr.mxu0 %v703_v34  ;;  %v532_v25 = vld [vmem:[%s1226_s7] ss:$0 sm:$0xff] }
  0x43   :  { %671 = vmatprep.mubr.msk.f32.mxu0 %vm704_vm0, %v703_v34  ;;  %640 = vmatpush3.msra.mxu0 %v428_v0  ;;  %p688_p3 = por %p687_p2, %p686_p1 }
  0x44   :  { %641 = vmatprep.subr.mxu0 %v703_v34 }
  0x45   :  { %642 = vmatpush3.msra.mxu0 %v427_v1  ;;  %p689_p4 = pnand %p688_p3, %p682_p0 }
  0x46   :  { %643 = vmatprep.subr.mxu0 %v703_v34 }
  0x47   :  { %644 = vmatpush3.msra.mxu0 %v426_v2 }
  0x48   :  { %645 = vmatprep.subr.mxu0 %v703_v34 }
  0x49   :  { %646 = vmatpush3.msra.mxu0 %v425_v3 }
  0x4a   :  { %647 = vmatprep.subr.mxu0 %v703_v34 }
  0x4b   :  { %648 = vmatpush3.msra.mxu0 %v424_v4 }
  0x4c   :  { %649 = vmatprep.subr.mxu0 %v703_v34 }
  0x4d   :  { %650 = vmatpush3.msra.mxu0 %v423_v5 }
  0x4e   :  { %651 = vmatprep.subr.mxu0 %v703_v34 }
  0x4f   :  { %652 = vmatpush3.msra.mxu0 %v422_v6 }
  0x50   :  { %653 = vmatprep.subr.mxu0 %v703_v34 }
  0x51   :  { %654 = vmatpush3.msra.mxu0 %v421_v7 }
  0x52   :  { %655 = vmatprep.subr.mxu0 %v703_v34 }
  0x53   :  { %656 = vmatpush3.msra.mxu0 %v420_v8 }
  0x54   :  { %657 = vmatprep.subr.mxu0 %v703_v34 }
  0x55   :  { %658 = vmatpush3.msra.mxu0 %v419_v9 }
  0x56   :  { %659 = vmatprep.subr.mxu0 %v703_v34 }
  0x57   :  { %660 = vmatpush3.msra.mxu0 %v418_v10 }
  0x58   :  { %661 = vmatprep.subr.mxu0 %v703_v34 }
  0x59   :  { %662 = vmatpush3.msra.mxu0 %v417_v17 }
  0x5a   :  { %663 = vmatprep.subr.mxu0 %v703_v34 }
  0x5b   :  { %664 = vmatpush3.msra.mxu0 %v416_v18 }
  0x5c   :  { %665 = vmatprep.subr.mxu0 %v703_v34 }
  0x5d   :  { %666 = vmatpush3.msra.mxu0 %v415_v19 }
  0x5e   :  { %667 = vmatprep.subr.mxu0 %v703_v34 }
  0x5f   :  { %668 = vmatpush3.msra.mxu0 %v414_v20 }
  0x60   :  { %669 = vmatprep.subr.mxu0 %v703_v34 }
  0x61   :  { %670 = vmatpush3.msra.mxu0 %v413_v21 }
 0x102   :  { %v185_v42 = vpop.f32.mrf.mxu0 }
 0x103   :  { %v186_v43 = vadd.f32 %v185_v42, %v112_v40 }
 0x104   :  { %v187_v44 = vpop.f32.mrf.mxu0 }
 0x105   :  { %v188_v45 = vadd.f32 %v187_v44, %v116_v41  ;;  %v190_v47 = vmax.f32 %v186_v43, 0.0 }
 0x107   :  { %v191_v46 = vmax.f32 %v188_v45, 0.0 }
 0x109   :  { %295 = vmatprep.mubr.f32.mxu1 %v191_v46 }
 0x10a   :  { %296 = vmatmul.mubr.f32.vlgmr.msra.gmra.mxu1 %v190_v47 }
 0x10b   :  { %605 = vmatpush3.msra.mxu1 %v317_v48  ;;  %636 = vmatprep.mubr.msk.f32.mxu1 %vm704_vm0, %v703_v34 }
 0x10c   :  { %606 = vmatprep.subr.mxu1 %v703_v34 }
 0x10d   :  { %607 = vmatpush3.msra.mxu1 %v316_v49 }
 0x10e   :  { %608 = vmatprep.subr.mxu1 %v703_v34 }
 0x10f   :  { %609 = vmatpush3.msra.mxu1 %v315_v50 }
 0x110   :  { %610 = vmatprep.subr.mxu1 %v703_v34 }
 0x111   :  { %611 = vmatpush3.msra.mxu1 %v314_v51 }
 0x112   :  { %612 = vmatprep.subr.mxu1 %v703_v34 }
 0x113   :  { %613 = vmatpush3.msra.mxu1 %v313_v52 }
 0x114   :  { %614 = vmatprep.subr.mxu1 %v703_v34 }
 0x115   :  { %615 = vmatpush3.msra.mxu1 %v312_v53 }
 0x116   :  { %616 = vmatprep.subr.mxu1 %v703_v34 }
 0x117   :  { %617 = vmatpush3.msra.mxu1 %v311_v54 }
 0x118   :  { %618 = vmatprep.subr.mxu1 %v703_v34 }
 0x119   :  { %619 = vmatpush3.msra.mxu1 %v310_v55 }
 0x11a   :  { %620 = vmatprep.subr.mxu1 %v703_v34 }
 0x11b   :  { %621 = vmatpush3.msra.mxu1 %v309_v56 }
 0x11c   :  { %622 = vmatprep.subr.mxu1 %v703_v34 }
 0x11d   :  { %623 = vmatpush3.msra.mxu1 %v308_v57 }
 0x11e   :  { %624 = vmatprep.subr.mxu1 %v703_v34 }
 0x11f   :  { %625 = vmatpush3.msra.mxu1 %v307_v58 }
 0x120   :  { %626 = vmatprep.subr.mxu1 %v703_v34 }
 0x121   :  { %627 = vmatpush3.msra.mxu1 %v306_v59 }
 0x122   :  { %628 = vmatprep.subr.mxu1 %v703_v34 }
 0x123   :  { %629 = vmatpush3.msra.mxu1 %v305_v60 }
 0x124   :  { %630 = vmatprep.subr.mxu1 %v703_v34 }
 0x125   :  { %631 = vmatpush3.msra.mxu1 %v304_v61 }
 0x126   :  { %632 = vmatprep.subr.mxu1 %v703_v34 }
 0x127   :  { %633 = vmatpush3.msra.mxu1 %v303_v62 }
 0x128   :  { %634 = vmatprep.subr.mxu1 %v703_v34 }
 0x129   :  { %635 = vmatpush3.msra.mxu1 %v302_v63 }
 0x1ca   :  { %v567_v11 = vpop.f32.mrf.mxu1 }
 0x1cc   :  { %v568_v13 = vpop.f32.mrf.mxu1 }
 0x1cd   :  { %v569_v14 = vadd.f32 %v568_v13, %v567_v11 }
 0x1cf   :  { %v298_v15 = vadd.f32 %v569_v14, %v530_v12 }
 0x1d1   :  { %v301_v16 = vmax.f32 %v298_v15, 0.0 }
 0x1d3   :  { %637 = vmatmul.mubr.f32.vlgmr.msra.gmra.mxu1 %v301_v16 }
 0x293   :  { %v391_v23 = vpop.f32.mrf.mxu1 }
 0x294   :  { %v392_v24 = vadd.f32 %v531_v22, %v391_v23 }
 0x295   :  { %v638_v26 = vpop.f32.mrf.mxu1 }
 0x296   :  { %v395_v27 = vmax.f32 %v392_v24, 0.0 }
 0x298   :  { %v403_v29 = vmul.f32 %v532_v25, %v395_v27 }
 0x29a   :  { %v411_v30 = vadd.f32 %v533_v28, %v403_v29 }
 0x29c   :  { %412 = vst [vmem:[#allocation2] sm:$0xff] %v411_v30  ;;  %672 = vmatmul.mubr.f32.vlgmr.msra.gmra.mxu0 %v411_v30 }
 0x29d   :  { %692 = shalt.err (!%p689_p4)
}
 0x29e   :  { %521 = dma.vmem_to_hbm [thread:$0]  %s519_s21, 128, %s1230_s11, [#allocation3]   ;;  %v534_v31 = vld [vmem:[%s1229_s10] ss:$0 sm:$0xff] }
 0x35c   :  { %v502_v32 = vpop.f32.mrf.mxu0 }
 0x35d   :  { %v503_v33 = vadd.f32 %v534_v31, %v502_v32 }
 0x35e   :  { %v673_v34 = vpop.f32.mrf.mxu0 }
 0x35f   :  { %v506_v35 = vsub.f32 0.0, %v503_v33 }
 0x361   :  { %v507_v36 = vmul.f32 1.442695, %v506_v35 }
 0x363   :  { %677 = vpow2.f32 %v507_v36 }
 0x370   :  { %v678_v37 = vpop.eup %677 }
 0x371   :  { %v509_v38 = vadd.f32 1.0, %v678_v37 }
 0x373   :  { %679 = vrcp.f32 %v509_v38 }
 0x380   :  { %v680_v39 = vpop.eup %679 }
 0x381   :  { %511 = vst [vmem:[%s1231_s12] sm:$0xff] %v680_v39 }
 0x382   :  { %701 = dma.done.wait [#allocation3], 128  }
 0x383   :  { %702 = vsyncadd [#allocation3], 4294967168 }
 0x384   :  { %529 = vsyncpa [#allocation3], 1 }

</bundles_post_ra>
